<compile_context>
chip_gen: v7x
topology: tpu7x:2x2x1
jax: 0.10.0
libtpu: 0.0.40
codegen_flags: <defaults>
</compile_context>

<pallas_src>
import functools

import jax
import jax.numpy as jnp
from jax.experimental import pallas as pl
from jax.experimental.pallas import tpu as pltpu


def _round_up(x, m):
    return (x + m - 1) // m * m


def _vmem_bytes(tm, th, d_in, d_out, out_bytes):
    """Approximate VMEM working set (double-buffered pipeline + scratch + temps)."""
    x_tiles = 2 * tm * d_in * 4            # streamed x tile (f32)
    w1_tiles = 2 * d_in * th * 2           # W1^T chunk (bf16)
    b1_tiles = 2 * th * 4
    w2_tiles = 2 * th * d_out * 2          # W2^T chunk (bf16)
    b2_tiles = 2 * d_out * 4
    out_tiles = 2 * tm * d_out * out_bytes
    acc = tm * d_out * 4                   # f32 accumulator scratch
    xb = tm * d_in * 2                     # bf16 x scratch
    temps = tm * th * 6                    # h (f32) + h (bf16) in-kernel temps
    return (x_tiles + w1_tiles + b1_tiles + w2_tiles + b2_tiles
            + out_tiles + acc + xb + temps)


def _ffn_kernel(x_ref, w1_ref, b1_ref, w2_ref, b2_ref, o_ref, xb_ref, acc_ref):
    # x_ref:  (tm, D_in)   input dtype (cast to bf16 once per token tile)
    # w1_ref: (D_in, th)   bf16 W1^T H-chunk
    # b1_ref: (1, th)      f32
    # w2_ref: (th, D_out)  bf16 W2^T H-chunk
    # b2_ref: (1, D_out)   f32
    # o_ref:  (tm, D_out)  out dtype
    # xb_ref: (tm, D_in)   bf16 scratch (persists across H chunks)
    # acc_ref:(tm, D_out)  f32 accumulator scratch
    j = pl.program_id(1)

    @pl.when(j == 0)
    def _():
        acc_ref[...] = jnp.zeros_like(acc_ref)
        xb_ref[...] = x_ref[...].astype(jnp.bfloat16)

    h = jnp.dot(xb_ref[...], w1_ref[...], preferred_element_type=jnp.float32)
    h = jnp.maximum(h + b1_ref[...], 0.0)          # bias + ReLU in f32
    # Dropout (eval/inference mode) == identity.
    acc_ref[...] += jnp.dot(h.astype(jnp.bfloat16), w2_ref[...],
                            preferred_element_type=jnp.float32)

    @pl.when(j == pl.num_programs(1) - 1)
    def _():
        o_ref[...] = (acc_ref[...] + b2_ref[...]).astype(o_ref.dtype)


@functools.partial(jax.jit, static_argnames=("tm", "out_dtype"))
def position_wise_ffn(x, w1, b1, w2, b2, *, tm=256, out_dtype=None):
    """Eval-mode position-wise FFN: linear2(relu(linear1(x))).

    x:  (..., D_in)
    w1: (H, D_in),  b1: (H,)      -- torch nn.Linear layout
    w2: (D_out, H), b2: (D_out,)
    out_dtype: output dtype (default: x.dtype). Pass jnp.bfloat16 to halve
               output HBM writeback when the consumer accepts it.
    """
    orig_shape = x.shape
    d_in = orig_shape[-1]
    hidden = w1.shape[0]
    d_out = w2.shape[0]
    m = 1
    for d in orig_shape[:-1]:
        m *= d

    out_dt = jnp.dtype(out_dtype) if out_dtype is not None else jnp.dtype(x.dtype)
    out_bytes = out_dt.itemsize

    # --- Hidden-dim chunking --------------------------------------------------
    # Small H: single 128-padded chunk (weight blocks have a constant block
    # index -> DMA'd once, effectively resident). Large H: stream 512-wide
    # slices so neither the weights nor the f32 intermediate must fit VMEM.
    h_p128 = _round_up(hidden, 128)
    if h_p128 <= 1024:
        th, h_pad = h_p128, h_p128
    else:
        th = 512
        h_pad = _round_up(hidden, th)

    # --- Token tile: multiple of 16 (dense sublane packing for bf16 temps) ----
    tm_eff = max(16, min(_round_up(tm, 16), _round_up(m, 16)))

    # --- Fit working set into a conservative per-core VMEM budget -------------
    budget = 30 << 20
    while _vmem_bytes(tm_eff, th, d_in, d_out, out_bytes) > budget and tm_eff > 64:
        tm_eff = max(64, _round_up(tm_eff // 2, 16))
    while (_vmem_bytes(tm_eff, th, d_in, d_out, out_bytes) > budget
           and th > 128 and (th // 2) % 128 == 0 and h_pad % (th // 2) == 0):
        th //= 2

    grid_m = pl.cdiv(m, tm_eff)
    grid_h = h_pad // th

    # --- Activation path: NO pad / cast copies --------------------------------
    x2d = x.reshape(m, d_in)

    # --- Weight prep (transpose + bf16 cast, zero-pad hidden axis only) -------
    # One-time / tiny relative to the activation stream.
    w1_bf = w1.T.astype(jnp.bfloat16)                  # (D_in, H)
    w2_bf = w2.T.astype(jnp.bfloat16)                  # (H, D_out)
    b1_f = b1.astype(jnp.float32).reshape(1, hidden)
    b2_f = b2.astype(jnp.float32).reshape(1, d_out)
    if h_pad != hidden:
        w1_t = jnp.zeros((d_in, h_pad), jnp.bfloat16).at[:, :hidden].set(w1_bf)
        w2_t = jnp.zeros((h_pad, d_out), jnp.bfloat16).at[:hidden, :].set(w2_bf)
        b1_p = jnp.zeros((1, h_pad), jnp.float32).at[:, :hidden].set(b1_f)
    else:
        w1_t, w2_t, b1_p = w1_bf, w2_bf, b1_f

    vmem_need = _vmem_bytes(tm_eff, th, d_in, d_out, out_bytes)
    vmem_limit = int(min(max(vmem_need * 3 // 2 + (2 << 20), 32 << 20), 48 << 20))

    flops = 2 * m * (d_in * h_pad + h_pad * d_out)
    bytes_accessed = int(m * d_in * x2d.dtype.itemsize
                         + w1_t.size * 2 + w2_t.size * 2
                         + b1_p.size * 4 + b2_f.size * 4
                         + m * d_out * out_bytes)

    # Deepen the x pipeline only in the memory-bound regime (tiny weights, many
    # token tiles) where the extra buffer is cheap and DMAs are exposed.
    x_spec_kwargs = {}
    if (grid_h == 1 and grid_m >= 3 and h_p128 <= 512
            and vmem_need + tm_eff * d_in * 4 <= budget):
        x_spec_kwargs["pipeline_mode"] = pl.Buffered(3)

    y2d = pl.pallas_call(
        _ffn_kernel,
        out_shape=jax.ShapeDtypeStruct((m, d_out), out_dt),
        grid_spec=pltpu.PrefetchScalarGridSpec(
            num_scalar_prefetch=0,
            grid=(grid_m, grid_h),
            in_specs=[
                # Streaming token tile (f32, cast to bf16 inside the kernel).
                pl.BlockSpec((tm_eff, d_in), lambda i, j: (i, 0), **x_spec_kwargs),
                # Hidden-chunked weights / bias (stream along the H grid axis).
                pl.BlockSpec((d_in, th), lambda i, j: (0, j)),
                pl.BlockSpec((1, th), lambda i, j: (0, j)),
                pl.BlockSpec((th, d_out), lambda i, j: (j, 0)),
                pl.BlockSpec((1, d_out), lambda i, j: (0, 0)),
            ],
            out_specs=pl.BlockSpec((tm_eff, d_out), lambda i, j: (i, 0)),
            scratch_shapes=[
                pltpu.VMEM((tm_eff, d_in), jnp.bfloat16),   # bf16 x tile
                pltpu.VMEM((tm_eff, d_out), jnp.float32),   # f32 accumulator
            ],
        ),
        compiler_params=pltpu.CompilerParams(
            # Token axis independent -> shard across TensorCores; hidden axis
            # is a reduction -> arbitrary (last grid axis by convention).
            dimension_semantics=("parallel", "arbitrary"),
            vmem_limit_bytes=vmem_limit,
        ),
        cost_estimate=pl.CostEstimate(
            flops=flops, transcendentals=0, bytes_accessed=bytes_accessed),
    )(x2d, w1_t, b1_p, w2_t, b2_f)

    return y2d.reshape(*orig_shape[:-1], d_out)


def init_params(key, input_size, hidden_size, output_size):
    """Deterministic init mimicking nn.Linear (uniform +/- 1/sqrt(fan_in))."""
    k1, k2, k3, k4 = jax.random.split(key, 4)
    lim1 = 1.0 / jnp.sqrt(float(input_size))
    lim2 = 1.0 / jnp.sqrt(float(hidden_size))
    w1 = jax.random.uniform(k1, (hidden_size, input_size), jnp.float32, -lim1, lim1)
    b1 = jax.random.uniform(k2, (hidden_size,), jnp.float32, -lim1, lim1)
    w2 = jax.random.uniform(k3, (output_size, hidden_size), jnp.float32, -lim2, lim2)
    b2 = jax.random.uniform(k4, (output_size,), jnp.float32, -lim2, lim2)
    return w1, b1, w2, b2


if __name__ == "__main__":
    batch, seq = 2, 8
    input_size, hidden_size, output_size = 32, 64, 32
    dropout = 0.1  # identity at inference

    key = jax.random.PRNGKey(0)
    kx, kp = jax.random.split(key)
    x = jax.random.normal(kx, (batch, seq, input_size), jnp.float32)
    w1, b1, w2, b2 = init_params(kp, input_size, hidden_size, output_size)

    y = position_wise_ffn(x, w1, b1, w2, b2)
    jax.block_until_ready(y)
    assert y.shape == (batch, seq, output_size)

    # Reference (same bf16 rounding of the matmul inputs, f32 accumulation).
    x2d = x.reshape(-1, input_size)
    xb = x2d.astype(jnp.bfloat16).astype(jnp.float32)
    w1b = w1.astype(jnp.bfloat16).astype(jnp.float32)
    w2b = w2.astype(jnp.bfloat16).astype(jnp.float32)
    h_ref = jnp.maximum(xb @ w1b.T + b1, 0.0)
    ref = h_ref.astype(jnp.bfloat16).astype(jnp.float32) @ w2b.T + b2

    y2d = y.reshape(-1, output_size)
    max_err = float(jnp.max(jnp.abs(y2d - ref)))
    assert jnp.allclose(y2d, ref, atol=1e-2, rtol=1e-2), f"max_err={max_err}"

    print("KERNEL_OK")
</pallas_src>

<mosaic_0001>
module attributes {stable_mosaic.version = 11 : i64} {
  func.func @_ffn_kernel(%arg0: i32, %arg1: i32, %arg2: memref<16x32xf32, #tpu.memory_space<vmem>>, %arg3: memref<32x128xbf16, #tpu.memory_space<vmem>>, %arg4: memref<1x128xf32, #tpu.memory_space<vmem>>, %arg5: memref<128x32xbf16, #tpu.memory_space<vmem>>, %arg6: memref<1x32xf32, #tpu.memory_space<vmem>>, %arg7: memref<16x32xf32, #tpu.memory_space<vmem>>, %arg8: memref<16x32xbf16, #tpu.memory_space<vmem>>, %arg9: memref<16x32xf32, #tpu.memory_space<vmem>>) attributes {dimension_semantics = [#tpu.dimension_semantics<parallel>, #tpu.dimension_semantics<arbitrary>], iteration_bounds = array<i64: 1, 1>, scalar_prefetch = 0 : i64, scratch_operands = 2 : i64, tpu.core_type = #tpu.core_type<tc>, window_params = [{transform_indices = @transform_0, window_bounds = array<i64: 16, 32>}, {transform_indices = @transform_1, window_bounds = array<i64: 32, 128>}, {transform_indices = @transform_2, window_bounds = array<i64: 1, 128>}, {transform_indices = @transform_3, window_bounds = array<i64: 128, 32>}, {pipeline_mode = #tpu.pipeline_mode<synchronous>, transform_indices = @transform_4, window_bounds = array<i64: 1, 32>}, {transform_indices = @transform_5, window_bounds = array<i64: 16, 32>}]} {
    %c0_i32 = arith.constant 0 : i32
    %0 = arith.cmpi eq, %arg1, %c0_i32 : i32
    %1 = arith.extui %0 : i1 to i32
    %c0_i32_0 = arith.constant 0 : i32
    %2 = arith.cmpi ne, %1, %c0_i32_0 : i32
    scf.if %2 {
      %cst_16 = arith.constant 0.000000e+00 : f32
      %20 = vector.broadcast %cst_16 : f32 to vector<16x32xf32>
      %c0_17 = arith.constant 0 : index
      %c0_18 = arith.constant 0 : index
      %21 = vector.load %arg9[%c0_17, %c0_18] : memref<16x32xf32, #tpu.memory_space<vmem>>, vector<16x32xf32>
      tpu.vector_store %arg9[%c0_17, %c0_18], %20 {strides = array<i32>} : memref<16x32xf32, #tpu.memory_space<vmem>>, vector<16x32xf32>,
      %c0_19 = arith.constant 0 : index
      %c0_20 = arith.constant 0 : index
      %22 = vector.load %arg2[%c0_19, %c0_20] : memref<16x32xf32, #tpu.memory_space<vmem>>, vector<16x32xf32>
      %23 = arith.truncf %22 : vector<16x32xf32> to vector<16x32xbf16>
      %c0_21 = arith.constant 0 : index
      %c0_22 = arith.constant 0 : index
      %24 = vector.load %arg8[%c0_21, %c0_22] : memref<16x32xbf16, #tpu.memory_space<vmem>>, vector<16x32xbf16>
      tpu.vector_store %arg8[%c0_21, %c0_22], %23 {strides = array<i32>} : memref<16x32xbf16, #tpu.memory_space<vmem>>, vector<16x32xbf16>,
    } else {
    }
    %c0 = arith.constant 0 : index
    %c0_1 = arith.constant 0 : index
    %3 = vector.load %arg8[%c0, %c0_1] : memref<16x32xbf16, #tpu.memory_space<vmem>>, vector<16x32xbf16>
    %c0_2 = arith.constant 0 : index
    %c0_3 = arith.constant 0 : index
    %4 = vector.load %arg3[%c0_2, %c0_3] : memref<32x128xbf16, #tpu.memory_space<vmem>>, vector<32x128xbf16>
    %cst = arith.constant dense<0.000000e+00> : vector<16x128xf32>
    %5 = tpu.matmul %3, %4, %cst {dimension_numbers = #tpu.dot_dimension_numbers<[1], [0], [0], [1], [0, 0, 1, 1], [], []>} : vector<16x32xbf16>, vector<32x128xbf16>, vector<16x128xf32> -> vector<16x128xf32>
    %c0_4 = arith.constant 0 : index
    %c0_5 = arith.constant 0 : index
    %6 = vector.load %arg4[%c0_4, %c0_5] : memref<1x128xf32, #tpu.memory_space<vmem>>, vector<1x128xf32>
    %7 = vector.broadcast %6 : vector<1x128xf32> to vector<16x128xf32>
    %8 = arith.addf %5, %7 : vector<16x128xf32>
    %cst_6 = arith.constant 0.000000e+00 : f32
    %9 = vector.broadcast %cst_6 : f32 to vector<16x128xf32>
    %10 = arith.maximumf %8, %9 : vector<16x128xf32>
    %c0_7 = arith.constant 0 : index
    %c0_8 = arith.constant 0 : index
    %11 = vector.load %arg9[%c0_7, %c0_8] : memref<16x32xf32, #tpu.memory_space<vmem>>, vector<16x32xf32>
    %12 = arith.truncf %10 : vector<16x128xf32> to vector<16x128xbf16>
    %c0_9 = arith.constant 0 : index
    %c0_10 = arith.constant 0 : index
    %13 = vector.load %arg5[%c0_9, %c0_10] : memref<128x32xbf16, #tpu.memory_space<vmem>>, vector<128x32xbf16>
    %cst_11 = arith.constant dense<0.000000e+00> : vector<16x32xf32>
    %14 = tpu.matmul %12, %13, %cst_11 {dimension_numbers = #tpu.dot_dimension_numbers<[1], [0], [0], [1], [0, 0, 1, 1], [], []>} : vector<16x128xbf16>, vector<128x32xbf16>, vector<16x32xf32> -> vector<16x32xf32>
    %15 = arith.addf %11, %14 : vector<16x32xf32>
    %c0_12 = arith.constant 0 : index
    %c0_13 = arith.constant 0 : index
    %16 = vector.load %arg9[%c0_12, %c0_13] : memref<16x32xf32, #tpu.memory_space<vmem>>, vector<16x32xf32>
    tpu.vector_store %arg9[%c0_12, %c0_13], %15 {strides = array<i32>} : memref<16x32xf32, #tpu.memory_space<vmem>>, vector<16x32xf32>,
    %c0_i32_14 = arith.constant 0 : i32
    %17 = arith.cmpi eq, %arg1, %c0_i32_14 : i32
    %18 = arith.extui %17 : i1 to i32
    %c0_i32_15 = arith.constant 0 : i32
    %19 = arith.cmpi ne, %18, %c0_i32_15 : i32
    scf.if %19 {
      %c0_16 = arith.constant 0 : index
      %c0_17 = arith.constant 0 : index
      %20 = vector.load %arg9[%c0_16, %c0_17] : memref<16x32xf32, #tpu.memory_space<vmem>>, vector<16x32xf32>
      %c0_18 = arith.constant 0 : index
      %c0_19 = arith.constant 0 : index
      %21 = vector.load %arg6[%c0_18, %c0_19] : memref<1x32xf32, #tpu.memory_space<vmem>>, vector<1x32xf32>
      %22 = vector.broadcast %21 : vector<1x32xf32> to vector<16x32xf32>
      %23 = arith.addf %20, %22 : vector<16x32xf32>
      %c0_20 = arith.constant 0 : index
      %c0_21 = arith.constant 0 : index
      %24 = vector.load %arg7[%c0_20, %c0_21] : memref<16x32xf32, #tpu.memory_space<vmem>>, vector<16x32xf32>
      tpu.vector_store %arg7[%c0_20, %c0_21], %23 {strides = array<i32>} : memref<16x32xf32, #tpu.memory_space<vmem>>, vector<16x32xf32>,
    } else {
    }
    return
  }
  func.func @transform_0(%arg0: i32, %arg1: i32) -> (i32, i32) {
    %c0_i32 = arith.constant 0 : i32
    %c0_i32_0 = arith.constant 0 : i32
    return %arg0, %c0_i32 : i32, i32
  }
  func.func @transform_1(%arg0: i32, %arg1: i32) -> (i32, i32) {
    %c0_i32 = arith.constant 0 : i32
    %c0_i32_0 = arith.constant 0 : i32
    return %c0_i32, %arg1 : i32, i32
  }
  func.func @transform_2(%arg0: i32, %arg1: i32) -> (i32, i32) {
    %c0_i32 = arith.constant 0 : i32
    %c0_i32_0 = arith.constant 0 : i32
    return %c0_i32, %arg1 : i32, i32
  }
  func.func @transform_3(%arg0: i32, %arg1: i32) -> (i32, i32) {
    %c0_i32 = arith.constant 0 : i32
    %c0_i32_0 = arith.constant 0 : i32
    return %arg1, %c0_i32 : i32, i32
  }
  func.func @transform_4(%arg0: i32, %arg1: i32) -> (i32, i32) {
    %c0_i32 = arith.constant 0 : i32
    %c0_i32_0 = arith.constant 0 : i32
    %c0_i32_1 = arith.constant 0 : i32
    return %c0_i32, %c0_i32_0 : i32, i32
  }
  func.func @transform_5(%arg0: i32, %arg1: i32) -> (i32, i32) {
    %c0_i32 = arith.constant 0 : i32
    %c0_i32_0 = arith.constant 0 : i32
    return %arg0, %c0_i32 : i32, i32
  }
}

</mosaic_0001>

<bundles_post_ra>
// kernel: position_wise_ffn.1
= control target key start
LH: loop header
LB: loop body
LE: loop exit
PB: predicated region body
PF: predicated region fallthrough
CT: control target
= control target key end

     0   :  { %v340_v1 = vmov 0.0   ;;  %vm341_vm0 = vmmov 0   ;;  %vm26_vm1 = vcmask 261120   ;;  %s437_s0 = inlined_call_operand.vmem [shape: f32[16,32], index: 0, kind: input, shape index: {}]   ;;  %s438_s1 = inlined_call_operand.vmem [shape: bf16[32,128], index: 1, kind: input, shape index: {}]   ;;  %s439_s2 = inlined_call_operand.vmem [shape: f32[1,128], index: 2, kind: input, shape index: {}]   ;;  %s440_s3 = inlined_call_operand.vmem [shape: bf16[128,32], index: 3, kind: input, shape index: {}]   ;;  %s441_s4 = inlined_call_operand.vmem [shape: f32[1,32], index: 4, kind: input, shape index: {}]   ;;  %s442_s5 = inlined_call_operand.hbm [shape: f32[16,32], index: 5, kind: output, shape index: {}]  }
   0x1   :  { %v306_v0 = vld [vmem:[%s438_s1] sm:$0xff]   ;;  %273 = vmatprep.subr.bf16.mxu0 %v340_v1  ;;  %v307_v2 = vld [vmem:[%s438_s1 + $0x8] sm:$0xff]   ;;  %281 = vmatprep.subr.bf16.mxu1 %v340_v1  ;;  %27 = vst.msk [vmem:[#allocation3] sm:$0xff] %vm26_vm1, %v340_v1  ;;  %28 = vst.msk [vmem:[#allocation3 + $0x8] sm:$0xff] %vm26_vm1, %v340_v1 }
   0x2   :  { %274 = vmatpush3.bf16.msra.mxu0 %v306_v0  ;;  %277 = vmatprep.mubr.msk.bf16.mxu0 %vm341_vm0, %v340_v1  ;;  %v29_v3 = vld [vmem:[%s437_s0] sm:$0xff]  ;;  %v30_v4 = vld [vmem:[%s437_s0 + $0x8] sm:$0xff]  ;;  %v310_v8 = vld [vmem:[%s440_s3 + $0x10] sm:$0xff]  }
   0x3   :  { %275 = vmatprep.subr.bf16.mxu0 %v340_v1  ;;  %v31_v5 = vpack.c.bf16 %v30_v4, %v29_v3  ;;  %v308_v6 = vld [vmem:[%s440_s3] sm:$0xff]   ;;  %297 = vmatprep.mubr.msk.bf16.mxu1 %vm341_vm0, %v340_v1  ;;  %v309_v7 = vld [vmem:[%s440_s3 + $0x8] sm:$0xff]  }
   0x4   :  { %282 = vmatpush3.bf16.msra.mxu1 %v308_v6 }
   0x5   :  { %32 = vst.msk [vmem:[#allocation2] sm:$0xff] %vm26_vm1, %v31_v5  ;;  %283 = vmatprep.subr.bf16.mxu1 %v340_v1 }
   0x6   :  { %276 = vmatpush3.bf16.msra.mxu0 %v307_v2 }
   0x8   :  { %284 = vmatpush3.bf16.msra.mxu1 %v309_v7 }
   0x9   :  { %285 = vmatprep.subr.bf16.mxu1 %v340_v1 }
   0xa   :  { %10 = vsyncpa [#allocation5], 0  ;;  %v311_v10 = vld [vmem:[%s440_s3 + $0x18] sm:$0xff]   ;;  %v312_v11 = vld [vmem:[%s440_s3 + $0x20] sm:$0xff]   ;;  %s342_s17 = smov [#allocation4]  }
   0xb   :  { %v313_v12 = vld [vmem:[%s440_s3 + $0x28] sm:$0xff]   ;;  %v314_v13 = vld [vmem:[%s440_s3 + $0x30] sm:$0xff]   ;;  %v315_v14 = vld [vmem:[%s440_s3 + $0x38] sm:$0xff]   ;;  %s237_s18 = sshll.u32 %s342_s17, 4  ;;  %s238_s18 = int_to_ptr.vmem [resolvable:$true] %s237_s18 }
   0xc   :  { %v33_v9 = vld [vmem:[#allocation2] sm:$0xff]  ;;  %286 = vmatpush3.bf16.msra.mxu1 %v310_v8  ;;  %v104_v25 = vld [vmem:[#allocation3] sm:$0xff]  ;;  %v105_v27 = vld [vmem:[#allocation3 + $0x8] sm:$0xff]  ;;  %s316_s19 = scalar_lea.vmem %s238_s18, 256  ;;  %p321_p1 = scmp.lt.s32.totalorder %s238_s18, %s238_s18 }
   0xd   :  { %278 = vmatmul.mubr.msk.bf16.vlgmr.msra.gmra.mrb[0].mxu0 %vm26_vm1, %v33_v9  ;;  %287 = vmatprep.subr.bf16.mxu1 %v340_v1  ;;  %v248_v15 = vld [vmem:[%s439_s2] ss:$0 sm:$0xff]  ;;  %p317_p0 = scmp.ne.s32.totalorder %s238_s18, %s316_s19  ;;  %p322_p2 = scmp.lt.s32.totalorder %s316_s19, %s316_s19 }
   0xe   :  { %v260_v33 = vld [vmem:[%s441_s4] ss:$0 sm:$0xff] }
   0xf   :  { %p323_p3 = por %p322_p2, %p321_p1 }
  0x10   :  { %288 = vmatpush3.bf16.msra.mxu1 %v311_v10 }
  0x11   :  { %289 = vmatprep.subr.bf16.mxu1 %v340_v1  ;;  %p324_p4 = pnand %p323_p3, %p317_p0 }
  0x14   :  { %290 = vmatpush3.bf16.msra.mxu1 %v312_v11 }
  0x15   :  { %291 = vmatprep.subr.bf16.mxu1 %v340_v1 }
  0x18   :  { %292 = vmatpush3.bf16.msra.mxu1 %v313_v12 }
  0x19   :  { %293 = vmatprep.subr.bf16.mxu1 %v340_v1 }
  0x1c   :  { %294 = vmatpush3.bf16.msra.mxu1 %v314_v13 }
  0x1d   :  { %295 = vmatprep.subr.bf16.mxu1 %v340_v1 }
  0x20   :  { %296 = vmatpush3.bf16.msra.mxu1 %v315_v14 }
  0xe0   :  { %v95_v16 = vpop.f32.mrb[0].mxu0 }
  0xe1   :  { %v96_v17 = vadd.f32 %v248_v15, %v95_v16  ;;  %v279_v18 = vpop.f32.mrb[1].mxu0 }
  0xe2   :  { %v98_v19 = vpop.f32.mrb[2].mxu0 }
  0xe3   :  { %v99_v20 = vadd.f32 %v248_v15, %v98_v19  ;;  %v280_v21 = vpop.f32.mrb[3].mxu0  ;;  %v102_v22 = vmax.f32 %v96_v17, 0.0 }
  0xe5   :  { %v103_v23 = vmax.f32 %v99_v20, 0.0 }
  0xe7   :  { %v106_v24 = vpack.c.bf16 %v103_v23, %v102_v22 }
  0xe9   :  { %298 = vmatmul.mubr.bf16.vlgmr.msra.gmra.mrb[0].mxu1 %v106_v24 }
 0x1bc   :  { %v205_v26 = vpop.f32.mrb[0].mxu1 }
 0x1bd   :  { %v212_v28 = vadd.f32 %v205_v26, %v104_v25  ;;  %v299_v29 = vpop.f32.mrb[1].mxu1 }
 0x1be   :  { %v208_v30 = vpop.f32.mrb[2].mxu1 }
 0x1bf   :  { %214 = vst.msk [vmem:[#allocation3] sm:$0xff] %vm26_vm1, %v212_v28  ;;  %v213_v31 = vadd.f32 %v208_v30, %v105_v27  ;;  %v300_v32 = vpop.f32.mrb[3].mxu1 }
 0x1c1   :  { %215 = vst.msk [vmem:[#allocation3 + $0x8] sm:$0xff] %vm26_vm1, %v213_v31 }
 0x1c6   :  { %v219_v34 = vld [vmem:[#allocation3] sm:$0xff] }
 0x1c7   :  { %v228_v35 = vadd.f32 %v260_v33, %v219_v34 }
 0x1c8   :  { %v220_v36 = vld [vmem:[#allocation3 + $0x8] sm:$0xff] }
 0x1c9   :  { %v229_v37 = vadd.f32 %v260_v33, %v220_v36  ;;  %230 = vst.msk [vmem:[#allocation4] sm:$0xff] %vm26_vm1, %v228_v35 }
 0x1cb   :  { %231 = vst.msk [vmem:[#allocation4 + $0x8] sm:$0xff] %vm26_vm1, %v229_v37 }
 0x1cc   :  { %327 = shalt.err (!%p324_p4)
}
 0x1cd   :  { %s328_s21 = scalar_lea.hbm %s442_s5, 256 }
 0x1ce   :  { %p329_p5 = scmp.ne.s32.totalorder %s442_s5, %s328_s21  ;;  %p332_p6 = scmp.lt.u32.totalorder %s328_s21, %s442_s5 }
 0x1d0   :  { %p334_p7 = pnand %p332_p6, %p329_p5 }
 0x1d2   :  { %337 = shalt.err (!%p334_p7)
}
 0x1d3   :  { %s343_s1 = smov 128   ;;  %s344_s26 = smov 8  }
 0x1d4   :  { %243 = dma.vmem_to_hbm [thread:$0]  %s238_s18, 256, %s442_s5, [#allocation5], %s343_s1, %s343_s1, %s344_s26  }
 0x1d5   :  { %338 = dma.done.wait [#allocation5], 256  }
 0x1d6   :  { %339 = vsyncadd [#allocation5], 4294967040 }
 0x1d7   :  { %247 = vsyncpa [#allocation5], 1 }

</bundles_post_ra>
